<compile_context>
chip_gen: v7x
topology: tpu7x:2x2x1
jax: 0.10.0
libtpu: 0.0.40
codegen_flags: <defaults>
</compile_context>

<pallas_src>
import math
from functools import partial

import jax
import jax.numpy as jnp
from jax.experimental import pallas as pl
from jax.experimental.pallas import tpu as pltpu

LANE = 128
SUBLANE = 8
DEFAULT_TILE_N = 128   # >=2 grid steps/TC on v7x; raise to 512-1024 on v5e/v6e for large n


def _round_up(x: int, m: int) -> int:
    return (x + m - 1) // m * m


def f1_kernel(x_ref, w0_ref, b0_ref, w1_ref, b1_ref, o_ref):
    # x_ref:  (tn, d)   f32  -> cast to bf16 in-kernel (no wrapper copy of x)
    # w0_ref: (d, h_p)  bf16    b0_ref: (1, h_p) f32
    # w1_ref: (h_p, k)  bf16    b1_ref: (1, k)   f32
    # o_ref:  (tn, k)   f32  (k left unpadded: minimal writeback bytes)
    x_bf = x_ref[...].astype(jnp.bfloat16)
    z0 = jnp.dot(x_bf, w0_ref[...],
                 preferred_element_type=jnp.float32) + b0_ref[...]
    a0 = jnp.maximum(z0, 0.0)                                   # ReLU in f32
    logits = jnp.dot(a0.astype(jnp.bfloat16), w1_ref[...],
                     preferred_element_type=jnp.float32) + b1_ref[...]
    o_ref[...] = logits                                         # f32 out


def prepare_f1_params(w0, b0, w1, b1):
    """One-time cast/pad of the static weights (hoisted out of the per-call path).

    W0 -> (d, h_p) bf16 with h padded to a lane-dense 128 (NOT 256);
    W1 -> (h_p, k) bf16; biases stay f32.  Zero padding is mathematically inert.
    """
    d, h = w0.shape
    k = w1.shape[1]
    h_p = _round_up(h, LANE)
    w0_p = jnp.zeros((d, h_p), jnp.bfloat16).at[:, :h].set(w0.astype(jnp.bfloat16))
    b0_p = jnp.zeros((1, h_p), jnp.float32).at[0, :h].set(b0.astype(jnp.float32))
    w1_p = jnp.zeros((h_p, k), jnp.bfloat16).at[:h, :].set(w1.astype(jnp.bfloat16))
    b1_p = b1.astype(jnp.float32).reshape(1, k)
    return w0_p, b0_p, w1_p, b1_p


@partial(jax.jit, static_argnames=("tile_n",))
def f1_forward(x, w0_p, b0_p, w1_p, b1_p, *, tile_n: int = DEFAULT_TILE_N):
    n, d = x.shape
    h_p = w0_p.shape[1]
    k = w1_p.shape[1]

    # Batch tile: clamp to a multiple of 8 (sublane rule).  x stays in its
    # native dtype; rows are only zero-padded when n isn't a tile multiple.
    tn = max(SUBLANE, (min(tile_n, _round_up(n, SUBLANE)) // SUBLANE) * SUBLANE)
    n_p = _round_up(n, tn)
    x_in = x if n_p == n else jnp.zeros((n_p, d), x.dtype).at[:n, :].set(x)

    flops = 2 * n_p * d * h_p + 2 * n_p * h_p * k
    bytes_accessed = (x_in.size * x_in.dtype.itemsize
                      + w0_p.size * 2 + w1_p.size * 2
                      + b0_p.size * 4 + b1_p.size * 4
                      + n_p * k * 4)

    out = pl.pallas_call(
        f1_kernel,
        out_shape=jax.ShapeDtypeStruct((n_p, k), jnp.float32),
        grid_spec=pltpu.PrefetchScalarGridSpec(
            num_scalar_prefetch=0,
            grid=(n_p // tn,),
            in_specs=[
                pl.BlockSpec((tn, d), lambda i: (i, 0)),     # x: tiled over n, full-d block
                pl.BlockSpec((d, h_p), lambda i: (0, 0)),    # W0: resident
                pl.BlockSpec((1, h_p), lambda i: (0, 0)),    # b0: resident
                pl.BlockSpec((h_p, k), lambda i: (0, 0)),    # W1: resident
                pl.BlockSpec((1, k), lambda i: (0, 0)),      # b1: resident
            ],
            out_specs=pl.BlockSpec((tn, k), lambda i: (i, 0)),
        ),
        compiler_params=pltpu.CompilerParams(
            dimension_semantics=("parallel",)),    # batch axis sharded on v7x's 2 TCs
        cost_estimate=pl.CostEstimate(
            flops=flops, transcendentals=0, bytes_accessed=bytes_accessed),
    )(x_in, w0_p, b0_p, w1_p, b1_p)

    return out if n_p == n else out[:n]


def init_f1_params(key, d, h, k):
    # Matches F1.__init__: W0 ~ U(-1/sqrt(d), 1/sqrt(d)),
    # W1 ~ U(-1/sqrt(h), 1/sqrt(h)), biases zero.  Deterministic via PRNGKey.
    k0, k1 = jax.random.split(key)
    bound0 = 1.0 / math.sqrt(d)
    bound1 = 1.0 / math.sqrt(h)
    w0 = jax.random.uniform(k0, (d, h), jnp.float32, -bound0, bound0)
    b0 = jnp.zeros((h,), jnp.float32)
    w1 = jax.random.uniform(k1, (h, k), jnp.float32, -bound1, bound1)
    b1 = jnp.zeros((k,), jnp.float32)
    return w0, b0, w1, b1


if __name__ == "__main__":
    # MNIST-style F1 dims (d=784, h=64, k=10); n=512 -> grid=(4,), so each
    # v7x TensorCore still gets 2 pipelined steps.
    n, d, h, k = 512, 784, 64, 10
    key = jax.random.PRNGKey(0)
    kx, kp = jax.random.split(key)
    x = jax.random.normal(kx, (n, d), jnp.float32)
    w0, b0, w1, b1 = init_f1_params(kp, d, h, k)

    # One-time weight prep (static across calls).
    w0_p, b0_p, w1_p, b1_p = prepare_f1_params(w0, b0, w1, b1)

    out = f1_forward(x, w0_p, b0_p, w1_p, b1_p)
    out = jax.block_until_ready(out)
    assert out.shape == (n, k)
    assert out.dtype == jnp.float32

    # f32 reference (same math as the PyTorch module).  Kernel matmuls run in
    # bf16 with f32 accumulation, so use a bf16-level tolerance.
    ref = jnp.maximum(x @ w0 + b0, 0.0) @ w1 + b1
    assert jnp.allclose(out, ref, atol=5e-2, rtol=5e-2), (
        float(jnp.max(jnp.abs(out - ref))))

    print("KERNEL_OK")
</pallas_src>

<mosaic_0001>
module attributes {stable_mosaic.version = 11 : i64} {
  func.func @f1_kernel(%arg0: i32, %arg1: memref<128x784xf32, #tpu.memory_space<vmem>>, %arg2: memref<784x128xbf16, #tpu.memory_space<vmem>>, %arg3: memref<1x128xf32, #tpu.memory_space<vmem>>, %arg4: memref<128x10xbf16, #tpu.memory_space<vmem>>, %arg5: memref<1x10xf32, #tpu.memory_space<vmem>>, %arg6: memref<128x10xf32, #tpu.memory_space<vmem>>) attributes {dimension_semantics = [#tpu.dimension_semantics<parallel>], iteration_bounds = array<i64: 4>, scalar_prefetch = 0 : i64, scratch_operands = 0 : i64, tpu.core_type = #tpu.core_type<tc>, window_params = [{transform_indices = @transform_0, window_bounds = array<i64: 128, 784>}, {pipeline_mode = #tpu.pipeline_mode<synchronous>, transform_indices = @transform_1, window_bounds = array<i64: 784, 128>}, {pipeline_mode = #tpu.pipeline_mode<synchronous>, transform_indices = @transform_2, window_bounds = array<i64: 1, 128>}, {pipeline_mode = #tpu.pipeline_mode<synchronous>, transform_indices = @transform_3, window_bounds = array<i64: 128, 10>}, {pipeline_mode = #tpu.pipeline_mode<synchronous>, transform_indices = @transform_4, window_bounds = array<i64: 1, 10>}, {transform_indices = @transform_5, window_bounds = array<i64: 128, 10>}]} {
    %c0 = arith.constant 0 : index
    %c0_0 = arith.constant 0 : index
    %0 = vector.load %arg1[%c0, %c0_0] : memref<128x784xf32, #tpu.memory_space<vmem>>, vector<128x784xf32>
    %1 = arith.truncf %0 : vector<128x784xf32> to vector<128x784xbf16>
    %c0_1 = arith.constant 0 : index
    %c0_2 = arith.constant 0 : index
    %2 = vector.load %arg2[%c0_1, %c0_2] : memref<784x128xbf16, #tpu.memory_space<vmem>>, vector<784x128xbf16>
    %cst = arith.constant dense<0.000000e+00> : vector<128x128xf32>
    %3 = tpu.matmul %1, %2, %cst {dimension_numbers = #tpu.dot_dimension_numbers<[1], [0], [0], [1], [0, 0, 1, 1], [], []>} : vector<128x784xbf16>, vector<784x128xbf16>, vector<128x128xf32> -> vector<128x128xf32>
    %c0_3 = arith.constant 0 : index
    %c0_4 = arith.constant 0 : index
    %4 = vector.load %arg3[%c0_3, %c0_4] : memref<1x128xf32, #tpu.memory_space<vmem>>, vector<1x128xf32>
    %5 = vector.broadcast %4 : vector<1x128xf32> to vector<128x128xf32>
    %6 = arith.addf %3, %5 : vector<128x128xf32>
    %cst_5 = arith.constant 0.000000e+00 : f32
    %7 = vector.broadcast %cst_5 : f32 to vector<128x128xf32>
    %8 = arith.maximumf %6, %7 : vector<128x128xf32>
    %9 = arith.truncf %8 : vector<128x128xf32> to vector<128x128xbf16>
    %c0_6 = arith.constant 0 : index
    %c0_7 = arith.constant 0 : index
    %10 = vector.load %arg4[%c0_6, %c0_7] : memref<128x10xbf16, #tpu.memory_space<vmem>>, vector<128x10xbf16>
    %cst_8 = arith.constant dense<0.000000e+00> : vector<128x10xf32>
    %11 = tpu.matmul %9, %10, %cst_8 {dimension_numbers = #tpu.dot_dimension_numbers<[1], [0], [0], [1], [0, 0, 1, 1], [], []>} : vector<128x128xbf16>, vector<128x10xbf16>, vector<128x10xf32> -> vector<128x10xf32>
    %c0_9 = arith.constant 0 : index
    %c0_10 = arith.constant 0 : index
    %12 = vector.load %arg5[%c0_9, %c0_10] : memref<1x10xf32, #tpu.memory_space<vmem>>, vector<1x10xf32>
    %13 = vector.broadcast %12 : vector<1x10xf32> to vector<128x10xf32>
    %14 = arith.addf %11, %13 : vector<128x10xf32>
    %c0_11 = arith.constant 0 : index
    %c0_12 = arith.constant 0 : index
    %15 = vector.load %arg6[%c0_11, %c0_12] : memref<128x10xf32, #tpu.memory_space<vmem>>, vector<128x10xf32>
    tpu.vector_store %arg6[%c0_11, %c0_12], %14 {strides = array<i32>} : memref<128x10xf32, #tpu.memory_space<vmem>>, vector<128x10xf32>,
    return
  }
  func.func @transform_0(%arg0: i32) -> (i32, i32) {
    %c0_i32 = arith.constant 0 : i32
    %c0_i32_0 = arith.constant 0 : i32
    return %arg0, %c0_i32 : i32, i32
  }
  func.func @transform_1(%arg0: i32) -> (i32, i32) {
    %c0_i32 = arith.constant 0 : i32
    %c0_i32_0 = arith.constant 0 : i32
    %c0_i32_1 = arith.constant 0 : i32
    return %c0_i32, %c0_i32_0 : i32, i32
  }
  func.func @transform_2(%arg0: i32) -> (i32, i32) {
    %c0_i32 = arith.constant 0 : i32
    %c0_i32_0 = arith.constant 0 : i32
    %c0_i32_1 = arith.constant 0 : i32
    return %c0_i32, %c0_i32_0 : i32, i32
  }
  func.func @transform_3(%arg0: i32) -> (i32, i32) {
    %c0_i32 = arith.constant 0 : i32
    %c0_i32_0 = arith.constant 0 : i32
    %c0_i32_1 = arith.constant 0 : i32
    return %c0_i32, %c0_i32_0 : i32, i32
  }
  func.func @transform_4(%arg0: i32) -> (i32, i32) {
    %c0_i32 = arith.constant 0 : i32
    %c0_i32_0 = arith.constant 0 : i32
    %c0_i32_1 = arith.constant 0 : i32
    return %c0_i32, %c0_i32_0 : i32, i32
  }
  func.func @transform_5(%arg0: i32) -> (i32, i32) {
    %c0_i32 = arith.constant 0 : i32
    %c0_i32_0 = arith.constant 0 : i32
    return %arg0, %c0_i32 : i32, i32
  }
}

</mosaic_0001>

<bundles_post_ra>
// kernel: f1_forward.1
= control target key start
LH: loop header
LB: loop body
LE: loop exit
PB: predicated region body
PF: predicated region fallthrough
CT: control target
= control target key end

     0   :  { %s1926_s18 = smov 0   ;;  %s2351_s0 = inlined_call_operand.vmem [shape: f32[512,784], index: 0, kind: input, shape index: {}]   ;;  %s2352_s1 = inlined_call_operand.vmem [shape: bf16[784,128], index: 1, kind: input, shape index: {}]   ;;  %s2353_s2 = inlined_call_operand.vmem [shape: f32[1,128], index: 2, kind: input, shape index: {}]   ;;  %s2354_s3 = inlined_call_operand.vmem [shape: bf16[128,10], index: 3, kind: input, shape index: {}]   ;;  %s2355_s4 = inlined_call_operand.vmem [shape: f32[1,10], index: 4, kind: input, shape index: {}]   ;;  %s2356_s5 = inlined_call_operand.vmem [shape: f32[512,10], index: 5, kind: output, shape index: {}]  }
   0x1 LB: > { %s1477_s19 = sadd.s32 4294967295, %s1894_s18   ;;  %p1481_p0 = scmp.ge.s32.totalorder %s1894_s18, 1  ;;  %s1894_s18 = sphi %s1926_s18, %s15_s18  }
   0x2   : > { %p189_p1 = scmp.lt.s32.totalorder %s1894_s18, 5 }
   0x4   : > { %p190_p2 = pnand %p1481_p0, %p189_p1 }
   0x5   : > { %v1831_v0 = vld [vmem:[%s2352_s1 + $0x40] sm:$0xff] (!%p190_p2)   ;;  %v1835_v4 = vld [vmem:[%s2352_s1 + $0x48] sm:$0xff] (!%p190_p2)   ;;  %v1839_v8 = vld [vmem:[%s2352_s1 + $0x50] sm:$0xff] (!%p190_p2)   ;;  %s1482_s25 = sshll.u32 (!%p190_p2), %s1477_s19, 4  ;;  %vm799_vm0 = vcmask (!%p190_p2), 130048   ;;  %vm1404_vm1 = vcmask (!%p190_p2), 80896  }
   0x6   : > { %193 = sbr.rel (%p190_p2) target bundleno = 601 (0x259), region = 40  ;;  %v1832_v1 = vld [vmem:[%s2352_s1] sm:$0xff] (!%p190_p2)   ;;  %1555 = vmatprep.subr.bf16.mxu0 (!%p190_p2), %v1831_v0  ;;  %v1836_v5 = vld [vmem:[%s2352_s1 + $0x8] sm:$0xff] (!%p190_p2)   ;;  %v1840_v9 = vld [vmem:[%s2352_s1 + $0x10] sm:$0xff] (!%p190_p2)   ;;  %p219_p3 = scmp.lt.s32.totalorder (!%p190_p2), %s1482_s25, 63 }
   0x7   : > { %v1833_v2 = vld [vmem:[%s2352_s1 + $0xc0] sm:$0xff] (!%p190_p2)   ;;  %1556 = vmatpush3.bf16.msra.mxu0 (!%p190_p2), %v1832_v1  ;;  %v1837_v6 = vld [vmem:[%s2352_s1 + $0xc8] sm:$0xff] (!%p190_p2)   ;;  %v1841_v10 = vld [vmem:[%s2352_s1 + $0xd0] sm:$0xff] (!%p190_p2)  }
   0x8   : > { %v1834_v3 = vld [vmem:[%s2352_s1 + $0x80] sm:$0xff] (!%p190_p2)   ;;  %1619 = vmatprep.subr.bf16.mxu1 (!%p190_p2), %v1833_v2  ;;  %1557 = vmatprep.subr.bf16.mxu0 (!%p190_p2), %v1835_v4  ;;  %v1838_v7 = vld [vmem:[%s2352_s1 + $0x88] sm:$0xff] (!%p190_p2)   ;;  %v1842_v11 = vld [vmem:[%s2352_s1 + $0x90] sm:$0xff] (!%p190_p2)  }
   0x9   : > { %1620 = vmatpush3.bf16.msra.mxu1 (!%p190_p2), %v1834_v3  ;;  %v1843_v12 = vld [vmem:[%s2352_s1 + $0x58] sm:$0xff] (!%p190_p2)   ;;  %v1847_v16 = vld [vmem:[%s2352_s1 + $0x60] sm:$0xff] (!%p190_p2)   ;;  %v1851_v20 = vld [vmem:[%s2352_s1 + $0x68] sm:$0xff] (!%p190_p2)  }
   0xa   : > { %1621 = vmatprep.subr.bf16.mxu1 (!%p190_p2), %v1837_v6  ;;  %v1844_v13 = vld [vmem:[%s2352_s1 + $0x18] sm:$0xff] (!%p190_p2)   ;;  %v1848_v17 = vld [vmem:[%s2352_s1 + $0x20] sm:$0xff] (!%p190_p2)   ;;  %v1852_v21 = vld [vmem:[%s2352_s1 + $0x28] sm:$0xff] (!%p190_p2)  }
   0xb   : > { %1558 = vmatpush3.bf16.msra.mxu0 (!%p190_p2), %v1836_v5  ;;  %v1845_v14 = vld [vmem:[%s2352_s1 + $0xd8] sm:$0xff] (!%p190_p2)   ;;  %v1849_v18 = vld [vmem:[%s2352_s1 + $0xe0] sm:$0xff] (!%p190_p2)   ;;  %v1853_v22 = vld [vmem:[%s2352_s1 + $0xe8] sm:$0xff] (!%p190_p2)  }
   0xc   : > { %1559 = vmatprep.subr.bf16.mxu0 (!%p190_p2), %v1839_v8  ;;  %v1846_v15 = vld [vmem:[%s2352_s1 + $0x98] sm:$0xff] (!%p190_p2)   ;;  %v1850_v19 = vld [vmem:[%s2352_s1 + $0xa0] sm:$0xff] (!%p190_p2)   ;;  %v1854_v23 = vld [vmem:[%s2352_s1 + $0xa8] sm:$0xff] (!%p190_p2)  }
   0xd   : > { %1622 = vmatpush3.bf16.msra.mxu1 %v1838_v7  ;;  %s2358_s25 = smov (!%p219_p3, %s1482_s25), 63  ;;  %v1855_v24 = vld [vmem:[%s2352_s1 + $0x70] sm:$0xff]   ;;  %v1859_v28 = vld [vmem:[%s2352_s1 + $0x78] sm:$0xff]   ;;  %v1863_v38 = vld [vmem:[%s2352_s1 + $0x140] sm:$0xff]  }
   0xe   : > { %1623 = vmatprep.subr.bf16.mxu1 %v1841_v10  ;;  %s1822_s24 = smul.u32 56, %s2358_s25  ;;  %v1856_v25 = vld [vmem:[%s2352_s1 + $0x30] sm:$0xff]   ;;  %v1860_v29 = vld [vmem:[%s2352_s1 + $0x38] sm:$0xff]   ;;  %v1864_v42 = vld [vmem:[%s2352_s1 + $0x100] sm:$0xff]   ;;  %s1485_s27 = sshll.u32 %s2358_s25, 3 }
   0xf   : > { %1560 = vmatpush3.bf16.msra.mxu0 %v1840_v9  ;;  %v1857_v26 = vld [vmem:[%s2352_s1 + $0xf0] sm:$0xff]   ;;  %v1861_v30 = vld [vmem:[%s2352_s1 + $0xf8] sm:$0xff]   ;;  %v1865_v51 = vld [vmem:[%s2352_s1 + $0x148] sm:$0xff]   ;;  %s2314_s7 = scalar_lea.vmem %s2356_s5, %s1485_s27 }
  0x10   : > { %1561 = vmatprep.subr.bf16.mxu0 %v1843_v12  ;;  %v1858_v27 = vld [vmem:[%s2352_s1 + $0xb0] sm:$0xff]   ;;  %s2029_s10 = scalar_lea.vmem %s2351_s0, %s1822_s24  ;;  %v1862_v34 = vld [vmem:[%s2352_s1 + $0xb8] sm:$0xff]   ;;  %v1866_v56 = vld [vmem:[%s2352_s1 + $0x108] sm:$0xff]  }
  0x11   : > { %1624 = vmatpush3.bf16.msra.mxu1 %v1842_v11  ;;  %v233_v31 = vld [vmem:[%s2029_s10 + $0x8] sm:$0xff]  ;;  %v240_v32 = vld [vmem:[%s2029_s10 + $0x40] sm:$0xff]  ;;  %v239_v36 = vld [vmem:[%s2029_s10 + $0x38] sm:$0xff] }
  0x12   : > { %1625 = vmatprep.subr.bf16.mxu1 %v1845_v14  ;;  %v345_v33 = vpack.c.bf16 %v240_v32, %v233_v31  ;;  %v232_v35 = vld [vmem:[%s2029_s10] sm:$0xff]  ;;  %v235_v39 = vld [vmem:[%s2029_s10 + $0x18] sm:$0xff]  ;;  %v242_v40 = vld [vmem:[%s2029_s10 + $0x50] sm:$0xff] }
  0x13   : > { %1562 = vmatpush3.bf16.msra.mxu0 %v1844_v13  ;;  %v344_v37 = vpack.c.bf16 %v239_v36, %v232_v35  ;;  %v347_v41 = vpack.c.bf16 %v242_v40, %v235_v39  ;;  %v234_v43 = vld [vmem:[%s2029_s10 + $0x10] sm:$0xff]  ;;  %v241_v44 = vld [vmem:[%s2029_s10 + $0x48] sm:$0xff]  ;;  %v247_v45 = vld [vmem:[%s2029_s10 + $0x78] sm:$0xff] }
  0x14   : > { %1563 = vmatprep.subr.bf16.mxu0 %v1847_v16  ;;  %856 = vmatprep.mubr.bf16.mxu0 %v345_v33  ;;  %v346_v46 = vpack.c.bf16 %v241_v44, %v234_v43  ;;  %v254_v47 = vld [vmem:[%s2029_s10 + $0xb0] sm:$0xff]  ;;  %v253_v49 = vld [vmem:[%s2029_s10 + $0xa8] sm:$0xff]  ;;  %v256_v53 = vld [vmem:[%s2029_s10 + $0xc0] sm:$0xff] }
  0x15   : > { %1626 = vmatpush3.bf16.msra.mxu1 %v1846_v15  ;;  %953 = vmatprep.mubr.bf16.mxu1 %v347_v41  ;;  %v246_v48 = vld [vmem:[%s2029_s10 + $0x70] sm:$0xff]  ;;  %v352_v50 = vpack.c.bf16 %v254_v47, %v247_v45  ;;  %v249_v52 = vld [vmem:[%s2029_s10 + $0x88] sm:$0xff]  ;;  %v248_v57 = vld [vmem:[%s2029_s10 + $0x80] sm:$0xff] }
  0x16   : > { %1627 = vmatprep.subr.bf16.mxu1 %v1849_v18  ;;  %v351_v54 = vpack.c.bf16 %v253_v49, %v246_v48  ;;  %v354_v55 = vpack.c.bf16 %v256_v53, %v249_v52  ;;  %v255_v58 = vld [vmem:[%s2029_s10 + $0xb8] sm:$0xff]  ;;  %v261_v59 = vld [vmem:[%s2029_s10 + $0xe8] sm:$0xff]  ;;  %v268_v60 = vld [vmem:[%s2029_s10 + $0x120] sm:$0xff] }
  0x17   : > { %1564 = vmatpush3.bf16.msra.mxu0 %v1848_v17  ;;  %v359_v61 = vpack.c.bf16 %v268_v60, %v261_v59  ;;  %v353_v62 = vpack.c.bf16 %v255_v58, %v248_v57  ;;  %v1867_v63 = vld [vmem:[%s2352_s1 + $0x150] sm:$0xff]   ;;  %v263_v0 = vld [vmem:[%s2029_s10 + $0xf8] sm:$0xff]  ;;  %v260_v2 = vld [vmem:[%s2029_s10 + $0xe0] sm:$0xff] }
  0x18   : > { %1565 = vmatprep.subr.bf16.mxu0 %v1851_v20  ;;  %v270_v1 = vld [vmem:[%s2029_s10 + $0x130] sm:$0xff]  ;;  %v267_v3 = vld [vmem:[%s2029_s10 + $0x118] sm:$0xff]  ;;  %v269_v9 = vld [vmem:[%s2029_s10 + $0x128] sm:$0xff] }
  0x19   : > { %1628 = vmatpush3.bf16.msra.mxu1 %v1850_v19  ;;  %v361_v4 = vpack.c.bf16 %v270_v1, %v263_v0  ;;  %v1868_v5 = vld [vmem:[%s2352_s1 + $0x110] sm:$0xff]   ;;  %v275_v7 = vld [vmem:[%s2029_s10 + $0x158] sm:$0xff]  ;;  %v358_v10 = vpack.c.bf16 %v267_v3, %v260_v2  ;;  %v277_v12 = vld [vmem:[%s2029_s10 + $0x168] sm:$0xff] }
  0x1a   : > { %1629 = vmatprep.subr.bf16.mxu1 %v1853_v22  ;;  %v262_v6 = vld [vmem:[%s2029_s10 + $0xf0] sm:$0xff]  ;;  %v1869_v11 = vld [vmem:[%s2352_s1 + $0x158] sm:$0xff]   ;;  %v284_v13 = vld [vmem:[%s2029_s10 + $0x1a0] sm:$0xff] }
  0x1b   : > { %1566 = vmatpush3.bf16.msra.mxu0 %v1852_v21  ;;  %v282_v8 = vld [vmem:[%s2029_s10 + $0x190] sm:$0xff]  ;;  %v1870_v15 = vld [vmem:[%s2352_s1 + $0x118] sm:$0xff]   ;;  %v360_v16 = vpack.c.bf16 %v269_v9, %v262_v6  ;;  %v368_v18 = vpack.c.bf16 %v284_v13, %v277_v12  ;;  %v1871_v19 = vld [vmem:[%s2352_s1 + $0x160] sm:$0xff]  }
  0x1c   : > { %1567 = vmatprep.subr.bf16.mxu0 %v1855_v24  ;;  %v366_v14 = vpack.c.bf16 %v282_v8, %v275_v7  ;;  %v274_v17 = vld [vmem:[%s2029_s10 + $0x150] sm:$0xff]  ;;  %v281_v20 = vld [vmem:[%s2029_s10 + $0x188] sm:$0xff]  ;;  %v296_v22 = vld [vmem:[%s2029_s10 + $0x200] sm:$0xff] }
  0x1d   : > { %1630 = vmatpush3.bf16.msra.mxu1 %v1854_v23  ;;  %v289_v21 = vld [vmem:[%s2029_s10 + $0x1c8] sm:$0xff]  ;;  %v1872_v23 = vld [vmem:[%s2352_s1 + $0x120] sm:$0xff]   ;;  %v365_v24 = vpack.c.bf16 %v281_v20, %v274_v17  ;;  %v295_v36 = vld [vmem:[%s2029_s10 + $0x1f8] sm:$0xff] }
  0x1e   : > { %1631 = vmatprep.subr.bf16.mxu1 %v1857_v26  ;;  %v283_v26 = vld [vmem:[%s2029_s10 + $0x198] sm:$0xff]  ;;  %v1874_v31 = vld [vmem:[%s2352_s1 + $0x168] sm:$0xff]   ;;  %v288_v35 = vld [vmem:[%s2029_s10 + $0x1c0] sm:$0xff] }
  0x1f   : > { %1568 = vmatpush3.bf16.msra.mxu0 %v1856_v25  ;;  %v276_v25 = vld [vmem:[%s2029_s10 + $0x160] sm:$0xff]  ;;  %v290_v39 = vld [vmem:[%s2029_s10 + $0x1d0] sm:$0xff]  ;;  %v297_v40 = vld [vmem:[%s2029_s10 + $0x208] sm:$0xff] }
  0x20   : > { %1569 = vmatprep.subr.bf16.mxu0 %v1859_v28  ;;  %v373_v28 = vpack.c.bf16 %v296_v22, %v289_v21  ;;  %v367_v32 = vpack.c.bf16 %v283_v26, %v276_v25  ;;  %v1876_v41 = vld [vmem:[%s2352_s1 + $0x170] sm:$0xff]   ;;  %v305_v45 = vld [vmem:[%s2029_s10 + $0x248] sm:$0xff]  ;;  %v374_v47 = vpack.c.bf16 %v297_v40, %v290_v39  ;;  %v1878_v48 = vld [vmem:[%s2352_s1 + $0x178] sm:$0xff]  }
  0x21   : > { %1632 = vmatpush3.bf16.msra.mxu1 %v1858_v27  ;;  %v1873_v27 = vld [vmem:[%s2352_s1 + $0x180] sm:$0xff]   ;;  %v1877_v43 = vld [vmem:[%s2352_s1 + $0x130] sm:$0xff]   ;;  %v1879_v52 = vld [vmem:[%s2352_s1 + $0x138] sm:$0xff]  }
  0x22   : > { %1633 = vmatprep.subr.bf16.mxu1 %v1861_v30  ;;  %v298_v30 = vld [vmem:[%s2029_s10 + $0x210] sm:$0xff]  ;;  %v317_v53 = vld [vmem:[%s2029_s10 + $0x2a8] sm:$0xff]  ;;  %v311_v57 = vld [vmem:[%s2029_s10 + $0x278] sm:$0xff] }
  0x23   : > { %1570 = vmatpush3.bf16.msra.mxu0 %v1860_v29  ;;  %v291_v29 = vld [vmem:[%s2029_s10 + $0x1d8] sm:$0xff]  ;;  %v302_v49 = vld [vmem:[%s2029_s10 + $0x230] sm:$0xff]  ;;  %v333_v7 = vld [vmem:[%s2029_s10 + $0x328] sm:$0xff] }
  0x24   : > { %1683 = vmatprep.subr.bf16.mxu0 %v1863_v38  ;;  %v375_v33 = vpack.c.bf16 %v298_v30, %v291_v29  ;;  %v310_v38 = vld [vmem:[%s2029_s10 + $0x270] sm:$0xff]  ;;  %v319_v59 = vld [vmem:[%s2029_s10 + $0x2b8] sm:$0xff]  ;;  %v340_v8 = vld [vmem:[%s2029_s10 + $0x360] sm:$0xff] }
  0x25   : > { %1634 = vmatpush3.bf16.msra.mxu1 %v1862_v34  ;;  %v1875_v34 = vld [vmem:[%s2352_s1 + $0x128] sm:$0xff]   ;;  %v326_v60 = vld [vmem:[%s2029_s10 + $0x2f0] sm:$0xff]  ;;  %v323_v0 = vld [vmem:[%s2029_s10 + $0x2d8] sm:$0xff] }
  0x26   : > { %857 = vmatmul.mubr.bf16.vlgmr.msra.gmra.mrb[0].mxu0 %v344_v37  ;;  %1772 = vmatprep.subr.bf16.mxu1 %v1873_v27  ;;  %v303_v37 = vld [vmem:[%s2029_s10 + $0x238] sm:$0xff]  ;;  %v338_v2 = vld [vmem:[%s2029_s10 + $0x350] sm:$0xff]  ;;  %v337_v12 = vld [vmem:[%s2029_s10 + $0x348] sm:$0xff] }
  0x27   : > { %1684 = vmatpush3.bf16.msra.mxu0 %v1864_v42  ;;  %864 = vmatprep.mubr.bf16.mxu0 %v352_v50  ;;  %v372_v42 = vpack.c.bf16 %v295_v36, %v288_v35  ;;  %v380_v44 = vpack.c.bf16 %v310_v38, %v303_v37  ;;  %v331_v1 = vld [vmem:[%s2029_s10 + $0x318] sm:$0xff]  ;;  %v237_v13 = vld [vmem:[%s2029_s10 + $0x28] sm:$0xff]  ;;  %v238_v17 = vld [vmem:[%s2029_s10 + $0x30] sm:$0xff] }
  0x28   : > { %954 = vmatmul.mubr.bf16.vlgmr.msra.gmra.mrb[0].mxu1 %v346_v46  ;;  %1685 = vmatprep.subr.bf16.mxu0 %v1865_v51  ;;  %v312_v46 = vld [vmem:[%s2029_s10 + $0x280] sm:$0xff]  ;;  %v309_v51 = vld [vmem:[%s2029_s10 + $0x268] sm:$0xff]  ;;  %v394_v6 = vpack.c.bf16 %v338_v2, %v331_v1  ;;  %v251_v25 = vld [vmem:[%s2029_s10 + $0x98] sm:$0xff] }
  0x29   : > { %961 = vmatprep.mubr.bf16.mxu1 %v354_v55  ;;  %1773 = vmatpush3.bf16.msra.mxu1 %v1873_v27  ;;  %v382_v50 = vpack.c.bf16 %v312_v46, %v305_v45  ;;  %v379_v55 = vpack.c.bf16 %v309_v51, %v302_v49  ;;  %v258_v26 = vld [vmem:[%s2029_s10 + $0xd0] sm:$0xff]  ;;  %v259_v29 = vld [vmem:[%s2029_s10 + $0xd8] sm:$0xff]  ;;  %v257_v36 = vld [vmem:[%s2029_s10 + $0xc8] sm:$0xff] }
  0x2a   : > { %v356_v30 = vpack.c.bf16 %v258_v26, %v251_v25  ;;  %v250_v35 = vld [vmem:[%s2029_s10 + $0x90] sm:$0xff]  ;;  %v265_v37 = vld [vmem:[%s2029_s10 + $0x108] sm:$0xff]  ;;  %v272_v38 = vld [vmem:[%s2029_s10 + $0x140] sm:$0xff] }
  0x2b   : > { %1686 = vmatpush3.bf16.msra.mxu0 %v1866_v56  ;;  %v304_v56 = vld [vmem:[%s2029_s10 + $0x240] sm:$0xff]  ;;  %v355_v39 = vpack.c.bf16 %v257_v36, %v250_v35  ;;  %v279_v49 = vld [vmem:[%s2029_s10 + $0x178] sm:$0xff]  ;;  %v1881_v26 = vld [vmem:[%s2354_s3 + $0x8] sm:$0xff]  }
  0x2c   : > { %1687 = vmatprep.subr.bf16.mxu0 %v1867_v63  ;;  %v316_v63 = vld [vmem:[%s2029_s10 + $0x2a0] sm:$0xff]  ;;  %v343_v1 = vld [vmem:[%s2029_s10 + $0x378] sm:$0xff] }
  0x2d   : > { %v386_v3 = vpack.c.bf16 %v323_v0, %v316_v63  ;;  %v280_v40 = vld [vmem:[%s2029_s10 + $0x180] sm:$0xff] }
  0x2e   : > { %865 = vmatmul.mubr.bf16.gmra.mrb[4].mxu0 %v351_v54  ;;  %v324_v54 = vld [vmem:[%s2029_s10 + $0x2e0] sm:$0xff] }
  0x2f   : > { %872 = vmatprep.mubr.bf16.mxu0 %v359_v61  ;;  %1688 = vmatpush3.bf16.msra.mxu0 %v1868_v5  ;;  %v387_v58 = vpack.c.bf16 %v324_v54, %v317_v53  ;;  %v381_v61 = vpack.c.bf16 %v311_v57, %v304_v56  ;;  %v325_v5 = vld [vmem:[%s2029_s10 + $0x2e8] sm:$0xff]  ;;  %v315_v53 = vld [vmem:[%s2029_s10 + $0x298] sm:$0xff]  ;;  %v336_v0 = vld [vmem:[%s2029_s10 + $0x340] sm:$0xff] }
  0x30   : > { %962 = vmatmul.mubr.bf16.gmra.mrb[4].mxu1 %v353_v62  ;;  %1689 = vmatprep.subr.bf16.mxu0 %v1869_v11  ;;  %v389_v62 = vpack.c.bf16 %v326_v60, %v319_v59  ;;  %v330_v11 = vld [vmem:[%s2029_s10 + $0x310] sm:$0xff]  ;;  %v329_v56 = vld [vmem:[%s2029_s10 + $0x308] sm:$0xff]  ;;  %v1880_v25 = vld [vmem:[%s2354_s3] sm:$0xff]  }
  0x31   : > { %969 = vmatprep.mubr.bf16.mxu1 %v361_v4  ;;  %v318_v4 = vld [vmem:[%s2029_s10 + $0x2b0] sm:$0xff]  ;;  %v285_v60 = vld [vmem:[%s2029_s10 + $0x1a8] sm:$0xff]  ;;  %1790 = vmatprep.subr.bf16.mxu1 %v1880_v25 }
  0x32   : > { %v388_v9 = vpack.c.bf16 %v325_v5, %v318_v4  ;;  %v278_v59 = vld [vmem:[%s2029_s10 + $0x170] sm:$0xff]  ;;  %v292_v4 = vld [vmem:[%s2029_s10 + $0x1e0] sm:$0xff]  ;;  %v299_v5 = vld [vmem:[%s2029_s10 + $0x218] sm:$0xff] }
  0x33   : > { %1690 = vmatpush3.bf16.msra.mxu0 %v1870_v15  ;;  %v339_v15 = vld [vmem:[%s2029_s10 + $0x358] sm:$0xff]  ;;  %v369_v63 = vpack.c.bf16 %v285_v60, %v278_v59 }
  0x34   : > { %1691 = vmatprep.subr.bf16.mxu0 %v1871_v19  ;;  %v393_v19 = vpack.c.bf16 %v337_v12, %v330_v11  ;;  %v313_v11 = vld [vmem:[%s2029_s10 + $0x288] sm:$0xff] }
  0x35   : > { %v321_v12 = vld [vmem:[%s2029_s10 + $0x2c8] sm:$0xff] }
  0x36   : > { %873 = vmatmul.mubr.bf16.gmra.mrb[8].mxu0 %v358_v10  ;;  %v396_v10 = vpack.c.bf16 %v340_v8, %v333_v7  ;;  %v314_v7 = vld [vmem:[%s2029_s10 + $0x290] sm:$0xff]  ;;  %v376_v8 = vpack.c.bf16 %v299_v5, %v292_v4 }
  0x37   : > { %880 = vmatprep.mubr.bf16.mxu0 %v366_v14  ;;  %1692 = vmatpush3.bf16.msra.mxu0 %v1872_v23  ;;  %v332_v14 = vld [vmem:[%s2029_s10 + $0x320] sm:$0xff] }
  0x38   : > { %970 = vmatmul.mubr.bf16.gmra.mrb[8].mxu1 %v360_v16  ;;  %1693 = vmatprep.subr.bf16.mxu0 %v1874_v31  ;;  %v244_v16 = vld [vmem:[%s2029_s10 + $0x60] sm:$0xff]  ;;  %v395_v21 = vpack.c.bf16 %v339_v15, %v332_v14  ;;  %v266_v31 = vld [vmem:[%s2029_s10 + $0x110] sm:$0xff] }
  0x39   : > { %977 = vmatprep.mubr.bf16.mxu1 %v368_v18  ;;  %v245_v18 = vld [vmem:[%s2029_s10 + $0x68] sm:$0xff]  ;;  %v349_v20 = vpack.c.bf16 %v244_v16, %v237_v13  ;;  %v236_v23 = vld [vmem:[%s2029_s10 + $0x20] sm:$0xff] }
  0x3a   : > { %v350_v22 = vpack.c.bf16 %v245_v18, %v238_v17  ;;  %v328_v13 = vld [vmem:[%s2029_s10 + $0x300] sm:$0xff]  ;;  %v327_v17 = vld [vmem:[%s2029_s10 + $0x2f8] sm:$0xff] }
  0x3b   : > { %1694 = vmatpush3.bf16.msra.mxu0 %v1875_v34  ;;  %v391_v15 = vpack.c.bf16 %v328_v13, %v321_v12  ;;  %v320_v16 = vld [vmem:[%s2029_s10 + $0x2c0] sm:$0xff]  ;;  %v335_v18 = vld [vmem:[%s2029_s10 + $0x338] sm:$0xff] }
  0x3c   : > { %1695 = vmatprep.subr.bf16.mxu0 %v1876_v41  ;;  %v287_v41 = vld [vmem:[%s2029_s10 + $0x1b8] sm:$0xff] }
  0x3d   : > { %v371_v45 = vpack.c.bf16 %v287_v41, %v280_v40 }
  0x3e   : > { %881 = vmatmul.mubr.bf16.gmra.mrb[12].mxu0 %v365_v24  ;;  %v243_v24 = vld [vmem:[%s2029_s10 + $0x58] sm:$0xff] }
  0x3f   : > { %888 = vmatprep.mubr.bf16.mxu0 %v373_v28  ;;  %1696 = vmatpush3.bf16.msra.mxu0 %v1877_v43  ;;  %v348_v27 = vpack.c.bf16 %v243_v24, %v236_v23  ;;  %v252_v28 = vld [vmem:[%s2029_s10 + $0xa0] sm:$0xff]  ;;  %v294_v43 = vld [vmem:[%s2029_s10 + $0x1f0] sm:$0xff]  ;;  %v341_v23 = vld [vmem:[%s2029_s10 + $0x368] sm:$0xff] }
  0x40   : > { %978 = vmatmul.mubr.bf16.gmra.mrb[12].mxu1 %v367_v32  ;;  %1697 = vmatprep.subr.bf16.mxu0 %v1878_v48  ;;  %v273_v32 = vld [vmem:[%s2029_s10 + $0x148] sm:$0xff]  ;;  %v271_v48 = vld [vmem:[%s2029_s10 + $0x138] sm:$0xff] }
  0x41   : > { %985 = vmatprep.mubr.bf16.mxu1 %v375_v33  ;;  %v357_v33 = vpack.c.bf16 %v259_v29, %v252_v28  ;;  %v364_v34 = vpack.c.bf16 %v273_v32, %v266_v31  ;;  %v1883_v28 = vld [vmem:[%s2354_s3 + $0x18] sm:$0xff]   ;;  %v1884_v29 = vld [vmem:[%s2354_s3 + $0x20] sm:$0xff]   ;;  %v1886_v31 = vld [vmem:[%s2354_s3 + $0x30] sm:$0xff]  }
  0x42   : > { %v1887_v32 = vld [vmem:[%s2354_s3 + $0x38] sm:$0xff]  }
  0x43   : > { %1698 = vmatpush3.bf16.msra.mxu0 %v1879_v52  ;;  %v308_v52 = vld [vmem:[%s2029_s10 + $0x260] sm:$0xff] }
  0x44   : > { %v385_v57 = vpack.c.bf16 %v315_v53, %v308_v52 }
  0x46   : > { %889 = vmatmul.mubr.bf16.gmra.mrb[16].mxu0 %v372_v42  ;;  %v363_v42 = vpack.c.bf16 %v272_v38, %v265_v37 }
  0x47   : > { %896 = vmatprep.mubr.bf16.mxu0 %v380_v44  ;;  %v301_v44 = vld [vmem:[%s2029_s10 + $0x228] sm:$0xff] }
  0x48   : > { %986 = vmatmul.mubr.bf16.gmra.mrb[16].mxu1 %v374_v47  ;;  %v378_v46 = vpack.c.bf16 %v301_v44, %v294_v43  ;;  %v264_v47 = vld [vmem:[%s2029_s10 + $0x100] sm:$0xff] }
  0x49   : > { %993 = vmatprep.mubr.bf16.mxu1 %v382_v50  ;;  %v286_v50 = vld [vmem:[%s2029_s10 + $0x1b0] sm:$0xff]  ;;  %v362_v51 = vpack.c.bf16 %v271_v48, %v264_v47 }
  0x4a   : > { %v370_v54 = vpack.c.bf16 %v286_v50, %v279_v49 }
  0x4e   : > { %897 = vmatmul.mubr.bf16.gmra.mrb[20].mxu0 %v379_v55  ;;  %v322_v55 = vld [vmem:[%s2029_s10 + $0x2d0] sm:$0xff] }
  0x4f   : > { %904 = vmatprep.mubr.bf16.mxu0 %v387_v58  ;;  %v392_v58 = vpack.c.bf16 %v329_v56, %v322_v55 }
  0x50   : > { %994 = vmatmul.mubr.bf16.gmra.mrb[20].mxu1 %v381_v61  ;;  %v293_v61 = vld [vmem:[%s2029_s10 + $0x1e8] sm:$0xff] }
  0x51   : > { %1001 = vmatprep.mubr.bf16.mxu1 %v389_v62  ;;  %v300_v62 = vld [vmem:[%s2029_s10 + $0x220] sm:$0xff] }
  0x52   : > { %v377_v2 = vpack.c.bf16 %v300_v62, %v293_v61 }
  0x56   : > { %905 = vmatmul.mubr.bf16.gmra.mrb[24].mxu0 %v386_v3  ;;  %v399_v3 = vpack.c.bf16 %v343_v1, %v336_v0 }
  0x57   : > { %912 = vmatprep.mubr.bf16.mxu0 %v394_v6  ;;  %v307_v6 = vld [vmem:[%s2029_s10 + $0x258] sm:$0xff] }
  0x58   : > { %1002 = vmatmul.mubr.bf16.gmra.mrb[24].mxu1 %v388_v9  ;;  %v384_v9 = vpack.c.bf16 %v314_v7, %v307_v6 }
  0x59   : > { %1009 = vmatprep.mubr.bf16.mxu1 %v396_v10  ;;  %v306_v10 = vld [vmem:[%s2029_s10 + $0x250] sm:$0xff] }
  0x5a   : > { %v383_v14 = vpack.c.bf16 %v313_v11, %v306_v10 }
  0x5e   : > { %913 = vmatmul.mubr.bf16.gmra.mrb[28].mxu0 %v393_v19  ;;  %v342_v19 = vld [vmem:[%s2029_s10 + $0x370] sm:$0xff] }
  0x5f   : > { %1050 = vmatprep.mubr.bf16.mxu0 %v349_v20  ;;  %v390_v20 = vpack.c.bf16 %v327_v17, %v320_v16 }
  0x60   : > { %1010 = vmatmul.mubr.bf16.gmra.mrb[28].mxu1 %v395_v21  ;;  %v398_v21 = vpack.c.bf16 %v342_v19, %v335_v18 }
  0x61   : > { %1774 = vmatprep.mubr.msk.bf16.mxu1 %vm799_vm0, %v350_v22  ;;  %v334_v22 = vld [vmem:[%s2029_s10 + $0x330] sm:$0xff] }
  0x62   : > { %v397_v24 = vpack.c.bf16 %v341_v23, %v334_v22 }
  0x66   : > { %1051 = vmatmul.mubr.bf16.vlgmr.msra.gmra.mrb[32].mxu0 %v348_v27  ;;  %v1882_v27 = vld [vmem:[%s2354_s3 + $0x10] sm:$0xff]  }
  0x67   : > { %1058 = vmatprep.mubr.bf16.mxu0 %v356_v30  ;;  %v1885_v30 = vld [vmem:[%s2354_s3 + $0x28] sm:$0xff]  }
  0x68   : > { %1775 = vmatmul.mubr.msk.bf16.vlgmr.msra.gmra.mrb[32].mxu1 %vm799_vm0, %v357_v33 }
  0x69   : > { %1778 = vmatprep.mubr.msk.bf16.mxu1 %vm799_vm0, %v364_v34  ;;  %1791 = vmatpush3.bf16.msra.mxu1 %v1880_v25  ;;  %v2238_v34 = vld [vmem:[%s2353_s2] ss:$0 sm:$0xff] }
  0x6a   : > { %1792 = vmatprep.subr.bf16.mxu1 %v1881_v26 }
  0x6d   : > { %1793 = vmatpush3.bf16.msra.mxu1 %v1881_v26 }
  0x6e   : > { %1059 = vmatmul.mubr.bf16.gmra.mrb[36].mxu0 %v355_v39  ;;  %1794 = vmatprep.subr.bf16.mxu1 %v1882_v27 }
  0x6f   : > { %1066 = vmatprep.mubr.bf16.mxu0 %v363_v42 }
  0x70   : > { %1779 = vmatmul.mubr.msk.bf16.gmra.mrb[36].mxu1 %vm799_vm0, %v371_v45 }
  0x71   : > { %1782 = vmatprep.mubr.msk.bf16.mxu1 %vm799_vm0, %v378_v46  ;;  %1795 = vmatpush3.bf16.msra.mxu1 %v1882_v27 }
  0x72   : > { %1796 = vmatprep.subr.bf16.mxu1 %v1883_v28 }
  0x75   : > { %1797 = vmatpush3.bf16.msra.mxu1 %v1883_v28 }
  0x76   : > { %1067 = vmatmul.mubr.bf16.gmra.mrb[40].mxu0 %v362_v51  ;;  %1798 = vmatprep.subr.bf16.mxu1 %v1884_v29 }
  0x77   : > { %1074 = vmatprep.mubr.bf16.mxu0 %v370_v54 }
  0x78   : > { %1783 = vmatmul.mubr.msk.bf16.gmra.mrb[40].mxu1 %vm799_vm0, %v385_v57 }
  0x79   : > { %1786 = vmatprep.mubr.msk.bf16.mxu1 %vm799_vm0, %v392_v58  ;;  %1799 = vmatpush3.bf16.msra.mxu1 %v1884_v29 }
  0x7a   : > { %1800 = vmatprep.subr.bf16.mxu1 %v1885_v30 }
  0x7d   : > { %1801 = vmatpush3.bf16.msra.mxu1 %v1885_v30 }
  0x7e   : > { %1075 = vmatmul.mubr.bf16.gmra.mrb[44].mxu0 %v369_v63  ;;  %1802 = vmatprep.subr.bf16.mxu1 %v1886_v31 }
  0x7f   : > { %1082 = vmatprep.mubr.bf16.mxu0 %v377_v2 }
  0x80   : > { %1787 = vmatmul.mubr.msk.bf16.gmra.mrb[44].mxu1 %vm799_vm0, %v399_v3 }
  0x81   : > { %1803 = vmatpush3.bf16.msra.mxu1 %v1886_v31 }
  0x82   : > { %1804 = vmatprep.subr.bf16.mxu1 %v1887_v32 }
  0x85   : > { %1805 = vmatpush3.bf16.msra.mxu1 %v1887_v32 }
  0x86   : > { %1083 = vmatmul.mubr.bf16.gmra.mrb[48].mxu0 %v376_v8 }
  0x87   : > { %1090 = vmatprep.mubr.bf16.mxu0 %v384_v9 }
  0x8e   : > { %1091 = vmatmul.mubr.bf16.gmra.mrb[52].mxu0 %v383_v14 }
  0x8f   : > { %1098 = vmatprep.mubr.bf16.mxu0 %v391_v15 }
  0x96   : > { %1099 = vmatmul.mubr.bf16.gmra.mrb[56].mxu0 %v390_v20 }
  0x97   : > { %1106 = vmatprep.mubr.bf16.mxu0 %v398_v21 }
  0x9e   : > { %1107 = vmatmul.mubr.bf16.gmra.mrb[60].mxu0 %v397_v24 }
  0xf9   : > { %v1571_v33 = vpop.f32.mrb[0].mxu0 }
  0xfa   : > { %v1572_v35 = vpop.f32.mrb[1].mxu0 }
  0xfb   : > { %v1573_v36 = vadd.f32 %v1572_v35, %v1571_v33  ;;  %v1574_v37 = vpop.f32.mrb[2].mxu0  ;;  %v1635_v38 = vpop.f32.mrb[0].mxu1 }
  0xfc   : > { %v1575_v39 = vpop.f32.mrb[3].mxu0  ;;  %v1636_v42 = vpop.f32.mrb[1].mxu1 }
  0xfd   : > { %v859_v40 = vadd.f32 %v1573_v36, %v2238_v34  ;;  %v1576_v41 = vadd.f32 %v1575_v39, %v1574_v37  ;;  %v1637_v43 = vadd.f32 %v1636_v42, %v1635_v38  ;;  %v1638_v44 = vpop.f32.mrb[2].mxu1 }
  0xfe   : > { %v1639_v46 = vpop.f32.mrb[3].mxu1 }
  0xff   : > { %v862_v45 = vadd.f32 %v1576_v41, %v2238_v34  ;;  %v2242_v47 = vadd.f32 %v1637_v43, %v859_v40  ;;  %v1640_v48 = vadd.f32 %v1639_v46, %v1638_v44 }
 0x101   : > { %v1577_v49 = vpop.f32.mrb[4].mxu0  ;;  %v2244_v50 = vadd.f32 %v1640_v48, %v862_v45 }
 0x102   : > { %v1578_v51 = vpop.f32.mrb[5].mxu0 }
 0x103   : > { %v1579_v52 = vadd.f32 %v1578_v51, %v1577_v49  ;;  %v1580_v53 = vpop.f32.mrb[6].mxu0  ;;  %v1641_v54 = vpop.f32.mrb[4].mxu1 }
 0x104   : > { %v1581_v55 = vpop.f32.mrb[7].mxu0  ;;  %v1642_v58 = vpop.f32.mrb[5].mxu1 }
 0x105   : > { %v867_v56 = vadd.f32 %v1579_v52, %v2238_v34  ;;  %v1582_v57 = vadd.f32 %v1581_v55, %v1580_v53  ;;  %v1643_v59 = vadd.f32 %v1642_v58, %v1641_v54  ;;  %v1644_v60 = vpop.f32.mrb[6].mxu1 }
 0x106   : > { %v1645_v62 = vpop.f32.mrb[7].mxu1 }
 0x107   : > { %v870_v61 = vadd.f32 %v1582_v57, %v2238_v34  ;;  %v2248_v63 = vadd.f32 %v1643_v59, %v867_v56  ;;  %v1646_v0 = vadd.f32 %v1645_v62, %v1644_v60 }
 0x109   : > { %v1583_v1 = vpop.f32.mrb[8].mxu0  ;;  %v2250_v2 = vadd.f32 %v1646_v0, %v870_v61 }
 0x10a   : > { %v1584_v3 = vpop.f32.mrb[9].mxu0 }
 0x10b   : > { %v1585_v4 = vadd.f32 %v1584_v3, %v1583_v1  ;;  %v1586_v5 = vpop.f32.mrb[10].mxu0  ;;  %v1647_v6 = vpop.f32.mrb[8].mxu1 }
 0x10c   : > { %v1587_v7 = vpop.f32.mrb[11].mxu0  ;;  %v1648_v10 = vpop.f32.mrb[9].mxu1 }
 0x10d   : > { %v875_v8 = vadd.f32 %v1585_v4, %v2238_v34  ;;  %v1588_v9 = vadd.f32 %v1587_v7, %v1586_v5  ;;  %v1649_v11 = vadd.f32 %v1648_v10, %v1647_v6  ;;  %v1650_v12 = vpop.f32.mrb[10].mxu1 }
 0x10e   : > { %v1651_v14 = vpop.f32.mrb[11].mxu1 }
 0x10f   : > { %v878_v13 = vadd.f32 %v1588_v9, %v2238_v34  ;;  %v2254_v15 = vadd.f32 %v1649_v11, %v875_v8  ;;  %v1652_v16 = vadd.f32 %v1651_v14, %v1650_v12 }
 0x111   : > { %v1589_v17 = vpop.f32.mrb[12].mxu0  ;;  %v2256_v18 = vadd.f32 %v1652_v16, %v878_v13 }
 0x112   : > { %v1590_v19 = vpop.f32.mrb[13].mxu0 }
 0x113   : > { %v1591_v20 = vadd.f32 %v1590_v19, %v1589_v17  ;;  %v1592_v21 = vpop.f32.mrb[14].mxu0  ;;  %v1653_v22 = vpop.f32.mrb[12].mxu1 }
 0x114   : > { %v1593_v23 = vpop.f32.mrb[15].mxu0  ;;  %v1654_v26 = vpop.f32.mrb[13].mxu1 }
 0x115   : > { %v883_v24 = vadd.f32 %v1591_v20, %v2238_v34  ;;  %v1594_v25 = vadd.f32 %v1593_v23, %v1592_v21  ;;  %v1655_v27 = vadd.f32 %v1654_v26, %v1653_v22  ;;  %v1656_v28 = vpop.f32.mrb[14].mxu1 }
 0x116   : > { %v1657_v30 = vpop.f32.mrb[15].mxu1 }
 0x117   : > { %v886_v29 = vadd.f32 %v1594_v25, %v2238_v34  ;;  %v2260_v31 = vadd.f32 %v1655_v27, %v883_v24  ;;  %v1658_v32 = vadd.f32 %v1657_v30, %v1656_v28 }
 0x119   : > { %v1595_v33 = vpop.f32.mrb[16].mxu0  ;;  %v2262_v35 = vadd.f32 %v1658_v32, %v886_v29 }
 0x11a   : > { %v1596_v36 = vpop.f32.mrb[17].mxu0 }
 0x11b   : > { %v1597_v37 = vadd.f32 %v1596_v36, %v1595_v33  ;;  %v1598_v38 = vpop.f32.mrb[18].mxu0  ;;  %v1659_v39 = vpop.f32.mrb[16].mxu1 }
 0x11c   : > { %v1599_v40 = vpop.f32.mrb[19].mxu0  ;;  %v1660_v43 = vpop.f32.mrb[17].mxu1 }
 0x11d   : > { %v891_v41 = vadd.f32 %v1597_v37, %v2238_v34  ;;  %v1600_v42 = vadd.f32 %v1599_v40, %v1598_v38  ;;  %v1661_v44 = vadd.f32 %v1660_v43, %v1659_v39  ;;  %v1662_v45 = vpop.f32.mrb[18].mxu1 }
 0x11e   : > { %v1663_v48 = vpop.f32.mrb[19].mxu1 }
 0x11f   : > { %v894_v46 = vadd.f32 %v1600_v42, %v2238_v34  ;;  %v2266_v49 = vadd.f32 %v1661_v44, %v891_v41  ;;  %v1664_v51 = vadd.f32 %v1663_v48, %v1662_v45 }
 0x121   : > { %v1601_v52 = vpop.f32.mrb[20].mxu0  ;;  %v2268_v53 = vadd.f32 %v1664_v51, %v894_v46 }
 0x122   : > { %v1602_v54 = vpop.f32.mrb[21].mxu0 }
 0x123   : > { %v1603_v55 = vadd.f32 %v1602_v54, %v1601_v52  ;;  %v1604_v56 = vpop.f32.mrb[22].mxu0  ;;  %v1665_v57 = vpop.f32.mrb[20].mxu1 }
 0x124   : > { %v1605_v58 = vpop.f32.mrb[23].mxu0  ;;  %v1666_v61 = vpop.f32.mrb[21].mxu1 }
 0x125   : > { %v899_v59 = vadd.f32 %v1603_v55, %v2238_v34  ;;  %v1606_v60 = vadd.f32 %v1605_v58, %v1604_v56  ;;  %v1667_v62 = vadd.f32 %v1666_v61, %v1665_v57  ;;  %v1668_v0 = vpop.f32.mrb[22].mxu1 }
 0x126   : > { %v1669_v3 = vpop.f32.mrb[23].mxu1 }
 0x127   : > { %v902_v1 = vadd.f32 %v1606_v60, %v2238_v34  ;;  %v2272_v4 = vadd.f32 %v1667_v62, %v899_v59  ;;  %v1670_v5 = vadd.f32 %v1669_v3, %v1668_v0 }
 0x129   : > { %v1607_v6 = vpop.f32.mrb[24].mxu0  ;;  %v2274_v7 = vadd.f32 %v1670_v5, %v902_v1 }
 0x12a   : > { %v1608_v8 = vpop.f32.mrb[25].mxu0 }
 0x12b   : > { %v1609_v9 = vadd.f32 %v1608_v8, %v1607_v6  ;;  %v1610_v10 = vpop.f32.mrb[26].mxu0  ;;  %v1671_v11 = vpop.f32.mrb[24].mxu1 }
 0x12c   : > { %v1611_v12 = vpop.f32.mrb[27].mxu0  ;;  %v1672_v16 = vpop.f32.mrb[25].mxu1 }
 0x12d   : > { %v907_v13 = vadd.f32 %v1609_v9, %v2238_v34  ;;  %v1612_v14 = vadd.f32 %v1611_v12, %v1610_v10  ;;  %v1673_v17 = vadd.f32 %v1672_v16, %v1671_v11  ;;  %v1674_v19 = vpop.f32.mrb[26].mxu1 }
 0x12e   : > { %v1675_v21 = vpop.f32.mrb[27].mxu1 }
 0x12f   : > { %v910_v20 = vadd.f32 %v1612_v14, %v2238_v34  ;;  %v2278_v22 = vadd.f32 %v1673_v17, %v907_v13  ;;  %v1676_v23 = vadd.f32 %v1675_v21, %v1674_v19 }
 0x131   : > { %v1613_v24 = vpop.f32.mrb[28].mxu0  ;;  %v2280_v25 = vadd.f32 %v1676_v23, %v910_v20 }
 0x132   : > { %v1614_v26 = vpop.f32.mrb[29].mxu0 }
 0x133   : > { %v1615_v27 = vadd.f32 %v1614_v26, %v1613_v24  ;;  %v1616_v28 = vpop.f32.mrb[30].mxu0  ;;  %v1677_v29 = vpop.f32.mrb[28].mxu1 }
 0x134   : > { %v1617_v30 = vpop.f32.mrb[31].mxu0  ;;  %v1678_v36 = vpop.f32.mrb[29].mxu1 }
 0x135   : > { %v915_v32 = vadd.f32 %v1615_v27, %v2238_v34  ;;  %v1618_v33 = vadd.f32 %v1617_v30, %v1616_v28  ;;  %v1679_v37 = vadd.f32 %v1678_v36, %v1677_v29  ;;  %v1680_v38 = vpop.f32.mrb[30].mxu1 }
 0x136   : > { %v1681_v40 = vpop.f32.mrb[31].mxu1 }
 0x137   : > { %v918_v39 = vadd.f32 %v1618_v33, %v2238_v34  ;;  %v2284_v41 = vadd.f32 %v1679_v37, %v915_v32  ;;  %v1682_v42 = vadd.f32 %v1681_v40, %v1680_v38 }
 0x139   : > { %v1699_v43 = vpop.f32.mrb[32].mxu0  ;;  %v2286_v44 = vadd.f32 %v1682_v42, %v918_v39 }
 0x13a   : > { %v1700_v45 = vpop.f32.mrb[33].mxu0 }
 0x13b   : > { %v1701_v46 = vadd.f32 %v1700_v45, %v1699_v43  ;;  %v1702_v48 = vpop.f32.mrb[34].mxu0  ;;  %v1776_v52 = vpop.f32.mrb[32].mxu1 }
 0x13c   : > { %v1703_v51 = vpop.f32.mrb[35].mxu0  ;;  %v1149_v56 = vpop.f32.mrb[33].mxu1 }
 0x13d   : > { %v1704_v54 = vadd.f32 %v1703_v51, %v1702_v48  ;;  %v1053_v55 = vadd.f32 %v1701_v46, %v2242_v47  ;;  %v1777_v57 = vpop.f32.mrb[34].mxu1 }
 0x13e   : > { %v1152_v59 = vpop.f32.mrb[35].mxu1 }
 0x13f   : > { %v1150_v58 = vadd.f32 %v1149_v56, %v1053_v55  ;;  %v1056_v34 = vadd.f32 %v1704_v54, %v2244_v50 }
 0x141   : > { %v1153_v60 = vadd.f32 %v1152_v59, %v1056_v34  ;;  %v1705_v61 = vpop.f32.mrb[36].mxu0  ;;  %v1212_v0 = vmax.f32 %v1150_v58, 0.0 }
 0x142   : > { %v1706_v62 = vpop.f32.mrb[37].mxu0 }
 0x143   : > { %v1213_v1 = vmax.f32 %v1153_v60, 0.0  ;;  %v1707_v3 = vadd.f32 %v1706_v62, %v1705_v61  ;;  %v1708_v5 = vpop.f32.mrb[38].mxu0  ;;  %v1780_v8 = vpop.f32.mrb[36].mxu1 }
 0x144   : > { %v1709_v6 = vpop.f32.mrb[39].mxu0  ;;  %v1165_v47 = vpop.f32.mrb[37].mxu1 }
 0x145   : > { %v1228_v9 = vpack.c.bf16 %v1213_v1, %v1212_v0  ;;  %v1061_v10 = vadd.f32 %v1707_v3, %v2248_v63  ;;  %v1710_v11 = vadd.f32 %v1709_v6, %v1708_v5  ;;  %v1781_v12 = vpop.f32.mrb[38].mxu1 }
 0x146   : > { %v1168_v50 = vpop.f32.mrb[39].mxu1 }
 0x147   : > { %v1158_v13 = vadd.f32 %v1776_v52, %v1061_v10  ;;  %v1064_v14 = vadd.f32 %v1710_v11, %v2250_v2  ;;  %1806 = vmatprep.mubr.bf16.mxu1 %v1228_v9 }
 0x149   : > { %v1161_v16 = vadd.f32 %v1777_v57, %v1064_v14  ;;  %v1711_v17 = vpop.f32.mrb[40].mxu0  ;;  %v1214_v20 = vmax.f32 %v1158_v13, 0.0 }
 0x14a   : > { %v1712_v19 = vpop.f32.mrb[41].mxu0 }
 0x14b   : > { %v1215_v21 = vmax.f32 %v1161_v16, 0.0  ;;  %v1713_v23 = vadd.f32 %v1712_v19, %v1711_v17  ;;  %v1714_v24 = vpop.f32.mrb[42].mxu0  ;;  %v1784_v27 = vpop.f32.mrb[40].mxu1 }
 0x14c   : > { %v1715_v26 = vpop.f32.mrb[43].mxu0  ;;  %v1181_v30 = vpop.f32.mrb[41].mxu1 }
 0x14d   : > { %v1229_v28 = vpack.c.bf16 %v1215_v21, %v1214_v20  ;;  %v1716_v29 = vadd.f32 %v1715_v26, %v1714_v24  ;;  %v1069_v63 = vadd.f32 %v1713_v23, %v2254_v15  ;;  %v1785_v32 = vpop.f32.mrb[42].mxu1 }
 0x14e   : > { %v1184_v36 = vpop.f32.mrb[43].mxu1 }
 0x14f   : > { %v1166_v33 = vadd.f32 %v1165_v47, %v1069_v63  ;;  %1807 = vmatmul.mubr.bf16.vlgmr.msra.gmra.mrb[48].mxu1 %v1229_v28  ;;  %v1072_v2 = vadd.f32 %v1716_v29, %v2256_v18 }
 0x151   : > { %v1169_v37 = vadd.f32 %v1168_v50, %v1072_v2  ;;  %v1717_v38 = vpop.f32.mrb[44].mxu0  ;;  %v1216_v40 = vmax.f32 %v1166_v33, 0.0 }
 0x152   : > { %v1718_v39 = vpop.f32.mrb[45].mxu0 }
 0x153   : > { %v1217_v42 = vmax.f32 %v1169_v37, 0.0  ;;  %v1719_v43 = vadd.f32 %v1718_v39, %v1717_v38  ;;  %v1720_v45 = vpop.f32.mrb[46].mxu0  ;;  %v2294_v48 = vpop.f32.mrb[44].mxu1 }
 0x154   : > { %v1721_v46 = vpop.f32.mrb[47].mxu0  ;;  %v1197_v54 = vpop.f32.mrb[45].mxu1 }
 0x155   : > { %v1230_v51 = vpack.c.bf16 %v1217_v42, %v1216_v40  ;;  %v1077_v15 = vadd.f32 %v1719_v43, %v2260_v31  ;;  %v1722_v52 = vadd.f32 %v1721_v46, %v1720_v45  ;;  %v1789_v55 = vpop.f32.mrb[46].mxu1 }
 0x156   : > { %v1200_v57 = vpop.f32.mrb[47].mxu1 }
 0x157   : > { %v1174_v56 = vadd.f32 %v1780_v8, %v1077_v15  ;;  %v1080_v18 = vadd.f32 %v1722_v52, %v2262_v35  ;;  %1810 = vmatprep.mubr.bf16.mxu1 %v1230_v51 }
 0x159   : > { %v1177_v58 = vadd.f32 %v1781_v12, %v1080_v18  ;;  %v1723_v34 = vpop.f32.mrb[48].mxu0  ;;  %v1218_v60 = vmax.f32 %v1174_v56, 0.0 }
 0x15a   : > { %v1724_v59 = vpop.f32.mrb[49].mxu0 }
 0x15b   : > { %v1219_v61 = vmax.f32 %v1177_v58, 0.0  ;;  %v1725_v62 = vadd.f32 %v1724_v59, %v1723_v34  ;;  %v1726_v0 = vpop.f32.mrb[50].mxu0 }
 0x15c   : > { %v1727_v1 = vpop.f32.mrb[51].mxu0 }
 0x15d   : > { %v1728_v3 = vadd.f32 %v1727_v1, %v1726_v0  ;;  %v1085_v5 = vadd.f32 %v1725_v62, %v2266_v49  ;;  %v1231_v31 = vpack.c.bf16 %v1219_v61, %v1218_v60 }
 0x15f   : > { %v1182_v6 = vadd.f32 %v1181_v30, %v1085_v5  ;;  %1811 = vmatmul.mubr.bf16.gmra.mrb[52].mxu1 %v1231_v31  ;;  %v1088_v8 = vadd.f32 %v1728_v3, %v2268_v53 }
 0x161   : > { %v1185_v9 = vadd.f32 %v1184_v36, %v1088_v8  ;;  %v1729_v35 = vpop.f32.mrb[52].mxu0  ;;  %v1220_v11 = vmax.f32 %v1182_v6, 0.0 }
 0x162   : > { %v1730_v10 = vpop.f32.mrb[53].mxu0 }
 0x163   : > { %v1221_v47 = vmax.f32 %v1185_v9, 0.0  ;;  %v1731_v12 = vadd.f32 %v1730_v10, %v1729_v35  ;;  %v1732_v13 = vpop.f32.mrb[54].mxu0 }
 0x164   : > { %v1733_v14 = vpop.f32.mrb[55].mxu0 }
 0x165   : > { %v1232_v50 = vpack.c.bf16 %v1221_v47, %v1220_v11  ;;  %v1093_v16 = vadd.f32 %v1731_v12, %v2272_v4  ;;  %v1734_v17 = vadd.f32 %v1733_v14, %v1732_v13 }
 0x167   : > { %v1190_v19 = vadd.f32 %v1784_v27, %v1093_v16  ;;  %v1096_v49 = vadd.f32 %v1734_v17, %v2274_v7  ;;  %1814 = vmatprep.mubr.bf16.mxu1 %v1232_v50 }
 0x169   : > { %v1193_v20 = vadd.f32 %v1785_v32, %v1096_v49  ;;  %v1735_v21 = vpop.f32.mrb[56].mxu0  ;;  %v1222_v53 = vmax.f32 %v1190_v19, 0.0 }
 0x16a   : > { %v1736_v23 = vpop.f32.mrb[57].mxu0 }
 0x16b   : > { %v1223_v24 = vmax.f32 %v1193_v20, 0.0  ;;  %v1737_v26 = vadd.f32 %v1736_v23, %v1735_v21  ;;  %v1738_v28 = vpop.f32.mrb[58].mxu0 }
 0x16c   : > { %v1739_v29 = vpop.f32.mrb[59].mxu0 }
 0x16d   : > { %v1740_v63 = vadd.f32 %v1739_v29, %v1738_v28  ;;  %v1101_v30 = vadd.f32 %v1737_v26, %v2278_v22  ;;  %v1233_v33 = vpack.c.bf16 %v1223_v24, %v1222_v53 }
 0x16f   : > { %v1198_v2 = vadd.f32 %v1197_v54, %v1101_v30  ;;  %1815 = vmatmul.mubr.bf16.gmra.mrb[56].mxu1 %v1233_v33  ;;  %v1104_v4 = vadd.f32 %v1740_v63, %v2280_v25  ;;  %v1544_v54 = vld [vmem:[%s2355_s4] ss:$0 sm:$0xff] }
 0x171   : > { %v1201_v27 = vadd.f32 %v1200_v57, %v1104_v4  ;;  %v1741_v36 = vpop.f32.mrb[60].mxu0  ;;  %v1224_v37 = vmax.f32 %v1198_v2, 0.0 }
 0x172   : > { %v1742_v7 = vpop.f32.mrb[61].mxu0 }
 0x173   : > { %v1225_v32 = vmax.f32 %v1201_v27, 0.0  ;;  %v1743_v38 = vadd.f32 %v1742_v7, %v1741_v36  ;;  %v1744_v39 = vpop.f32.mrb[62].mxu0 }
 0x174   : > { %v1745_v40 = vpop.f32.mrb[63].mxu0 }
 0x175   : > { %v1234_v42 = vpack.c.bf16 %v1225_v32, %v1224_v37  ;;  %v1109_v43 = vadd.f32 %v1743_v38, %v2284_v41  ;;  %v1746_v45 = vadd.f32 %v1745_v40, %v1744_v39 }
 0x177   : > { %v1206_v22 = vadd.f32 %v2294_v48, %v1109_v43  ;;  %v1112_v46 = vadd.f32 %v1746_v45, %v2286_v44  ;;  %1818 = vmatprep.mubr.bf16.mxu1 %v1234_v42 }
 0x179   : > { %v1209_v51 = vadd.f32 %v1789_v55, %v1112_v46  ;;  %v1226_v25 = vmax.f32 %v1206_v22, 0.0 }
 0x17b   : > { %v1227_v15 = vmax.f32 %v1209_v51, 0.0 }
 0x17d   : > { %v1235_v52 = vpack.c.bf16 %v1227_v15, %v1226_v25 }
 0x17f   : > { %1819 = vmatmul.mubr.bf16.gmra.mrb[60].mxu1 %v1235_v52 }
 0x222   : > { %v1808_v41 = vpop.f32.mrb[48].mxu1 }
 0x223   : > { %v1350_v44 = vadd.f32 %v1808_v41, %v1544_v54  ;;  %v1341_v48 = vpop.f32.mrb[49].mxu1 }
 0x224   : > { %v1342_v55 = vadd.f32 %v1544_v54, %v1341_v48  ;;  %v1809_v56 = vpop.f32.mrb[50].mxu1 }
 0x225   : > { %1407 = vst.msk [vmem:[%s2314_s7 + $0x10] sm:$0xff] %vm1404_vm1, %v1350_v44  ;;  %v1353_v18 = vadd.f32 %v1809_v56, %v1544_v54  ;;  %v1344_v57 = vpop.f32.mrb[51].mxu1 }
 0x226   : > { %1405 = vst.msk [vmem:[%s2314_s7] sm:$0xff] %vm1404_vm1, %v1342_v55  ;;  %v1345_v58 = vadd.f32 %v1544_v54, %v1344_v57 }
 0x227   : > { %1408 = vst.msk [vmem:[%s2314_s7 + $0x18] sm:$0xff] %vm1404_vm1, %v1353_v18 }
 0x228   : > { %1406 = vst.msk [vmem:[%s2314_s7 + $0x8] sm:$0xff] %vm1404_vm1, %v1345_v58 }
 0x232   : > { %v1812_v34 = vpop.f32.mrb[52].mxu1 }
 0x233   : > { %v1366_v59 = vadd.f32 %v1812_v34, %v1544_v54  ;;  %v1357_v60 = vpop.f32.mrb[53].mxu1 }
 0x234   : > { %v1358_v61 = vadd.f32 %v1544_v54, %v1357_v60  ;;  %v1813_v62 = vpop.f32.mrb[54].mxu1 }
 0x235   : > { %1411 = vst.msk [vmem:[%s2314_s7 + $0x30] sm:$0xff] %vm1404_vm1, %v1366_v59  ;;  %v1369_v0 = vadd.f32 %v1813_v62, %v1544_v54  ;;  %v1360_v1 = vpop.f32.mrb[55].mxu1 }
 0x236   : > { %1409 = vst.msk [vmem:[%s2314_s7 + $0x20] sm:$0xff] %vm1404_vm1, %v1358_v61  ;;  %v1361_v3 = vadd.f32 %v1544_v54, %v1360_v1 }
 0x237   : > { %1412 = vst.msk [vmem:[%s2314_s7 + $0x38] sm:$0xff] %vm1404_vm1, %v1369_v0 }
 0x238   : > { %1410 = vst.msk [vmem:[%s2314_s7 + $0x28] sm:$0xff] %vm1404_vm1, %v1361_v3 }
 0x242   : > { %v1816_v5 = vpop.f32.mrb[56].mxu1 }
 0x243   : > { %v1382_v31 = vadd.f32 %v1816_v5, %v1544_v54  ;;  %v1373_v6 = vpop.f32.mrb[57].mxu1 }
 0x244   : > { %v1374_v8 = vadd.f32 %v1544_v54, %v1373_v6  ;;  %v1817_v9 = vpop.f32.mrb[58].mxu1 }
 0x245   : > { %1415 = vst.msk [vmem:[%s2314_s7 + $0x50] sm:$0xff] %vm1404_vm1, %v1382_v31  ;;  %v1385_v35 = vadd.f32 %v1817_v9, %v1544_v54  ;;  %v1376_v10 = vpop.f32.mrb[59].mxu1 }
 0x246   : > { %1413 = vst.msk [vmem:[%s2314_s7 + $0x40] sm:$0xff] %vm1404_vm1, %v1374_v8  ;;  %v1377_v11 = vadd.f32 %v1544_v54, %v1376_v10 }
 0x247   : > { %1416 = vst.msk [vmem:[%s2314_s7 + $0x58] sm:$0xff] %vm1404_vm1, %v1385_v35 }
 0x248   : > { %1414 = vst.msk [vmem:[%s2314_s7 + $0x48] sm:$0xff] %vm1404_vm1, %v1377_v11 }
 0x252   : > { %v1820_v47 = vpop.f32.mrb[60].mxu1 }
 0x253   : > { %v1398_v12 = vadd.f32 %v1820_v47, %v1544_v54  ;;  %v1389_v13 = vpop.f32.mrb[61].mxu1 }
 0x254   : > { %v1390_v14 = vadd.f32 %v1544_v54, %v1389_v13  ;;  %v1821_v50 = vpop.f32.mrb[62].mxu1 }
 0x255   : > { %1419 = vst.msk [vmem:[%s2314_s7 + $0x70] sm:$0xff] %vm1404_vm1, %v1398_v12  ;;  %v1401_v16 = vadd.f32 %v1821_v50, %v1544_v54  ;;  %v1392_v17 = vpop.f32.mrb[63].mxu1 }
 0x256   : > { %1417 = vst.msk [vmem:[%s2314_s7 + $0x60] sm:$0xff] %vm1404_vm1, %v1390_v14  ;;  %v1393_v19 = vadd.f32 %v1544_v54, %v1392_v17 }
 0x257   : > { %1420 = vst.msk [vmem:[%s2314_s7 + $0x78] sm:$0xff] %vm1404_vm1, %v1401_v16 }
 0x258   : > { %1418 = vst.msk [vmem:[%s2314_s7 + $0x68] sm:$0xff] %vm1404_vm1, %v1393_v19 }
 0x259 PF: > { %s15_s18 = sadd.s32 1, %s1894_s18  }
 0x25a   : > { %p12_p4 = scmp.ge.s32.totalorder %s15_s18, 6  }
 0x25c   :  { %14 = sbr.rel (!%p12_p4) target bundleno = 1 (0x1), region = 70 }

</bundles_post_ra>
